<compile_context>
chip_gen: v7x
topology: tpu7x:2x2x1
jax: 0.10.0
libtpu: 0.0.40
codegen_flags: <defaults>
</compile_context>

<pallas_src>
import functools

import jax
import jax.numpy as jnp
from jax.experimental import pallas as pl
from jax.experimental.pallas import tpu as pltpu


def _round_up(x, m):
    return (x + m - 1) // m * m


def _conv1d_relu_kernel(x_ref, xh_ref, w_ref, b_ref, o_ref, *, k_taps, fuse, co_chunk):
    # x_ref : (1, TL, C_in)        main input tile  (rows [lt*TL, lt*TL+TL))
    # xh_ref: (1, HALO, C_in)      halo rows        (rows [lt*TL+TL, lt*TL+TL+HALO))
    # w_ref : (K*C_in, C_out_pad)  if fuse else (K, C_in, C_out_pad)
    # b_ref : (1, C_out_pad)       bias (f32)
    # o_ref : (1, TL, C_out_pad)   output tile
    tl = x_ref.shape[1]
    c_out_pad = o_ref.shape[2]
    w_dtype = w_ref.dtype

    xm = x_ref[0]                                                  # (TL, C_in)
    if k_taps > 1:
        window = jnp.concatenate([xm, xh_ref[0]], axis=0)          # (TL+HALO, C_in)
    else:
        window = xm

    cols = None
    if fuse:
        if k_taps > 1:
            # im2col slab: K shifted copies side-by-side -> one deep MXU matmul.
            cols = jnp.concatenate(
                [window[k:k + tl, :] for k in range(k_taps)], axis=-1)   # (TL, K*C_in)
        else:
            cols = window[:tl, :]
        if cols.dtype != w_dtype:
            cols = cols.astype(w_dtype)

    # Chunk C_out so the f32 accumulator stays within the vreg/VMEM scratch budget.
    for co in range(0, c_out_pad, co_chunk):
        bias = b_ref[:, co:co + co_chunk].astype(jnp.float32)      # (1, co_chunk)
        acc = jnp.broadcast_to(bias, (tl, co_chunk))               # init acc from bias
        if fuse:
            acc = acc + jnp.dot(cols, w_ref[:, co:co + co_chunk],
                                preferred_element_type=jnp.float32)
        else:
            for k in range(k_taps):
                lhs = window[k:k + tl, :]
                if lhs.dtype != w_dtype:
                    lhs = lhs.astype(w_dtype)
                acc = acc + jnp.dot(lhs, w_ref[k, :, co:co + co_chunk],
                                    preferred_element_type=jnp.float32)
        o_ref[0, :, co:co + co_chunk] = jnp.maximum(acc, 0.0).astype(o_ref.dtype)


def conv1d_relu_nlc(x_nlc, weight, bias, *, stride=1, padding=0, use_bf16_matmul=False):
    """Channels-last Conv1d + ReLU.

    x_nlc: (B, L, C_in); weight: (C_out, C_in, K) [PyTorch layout]; bias: (C_out,).
    Returns (B, L_out, C_out).
    """
    if stride != 1:
        # TODO(synk): generalize kernel to stride > 1 (strided window gather).
        raise NotImplementedError("only stride=1 implemented")

    b, l, c_in = x_nlc.shape
    c_out, c_in_w, k = weight.shape
    assert c_in == c_in_w
    l_out = l + 2 * padding - k + 1
    assert l_out > 0

    # ---- static tiling decisions -------------------------------------------
    c_out_pad = _round_up(c_out, 128)             # lane-dense output stores
    halo = max(8, _round_up(max(k - 1, 1), 8))    # sublane-aligned K-1 halo
    co_chunk = min(c_out_pad, 256)                # lane tile for the accumulator
    itemsize = jnp.dtype(x_nlc.dtype).itemsize

    # L tile: as large as 512 rows (good HBM-roofline point) subject to
    #   (a) f32 accumulator (tl, co_chunk) <= ~256 KiB, and
    #   (b) double-buffered in+out tiles <= ~8 MiB of VMEM.
    tl = 512
    tl = min(tl, max(128, (64 * 1024) // co_chunk))
    bytes_per_row = max((c_in + c_out_pad) * itemsize, 1)
    tl = min(tl, max(128, (4 * 1024 * 1024) // bytes_per_row))
    tl = min(tl, _round_up(l_out, 8))
    tl = _round_up(tl, halo)
    num_l_tiles = pl.cdiv(l_out, tl)
    l_out_alloc = num_l_tiles * tl
    l_x = l_out_alloc + halo                      # padded input length the kernel sees
    halo_stride = tl // halo                      # halo block-index multiplier

    fuse = (k * c_in) <= 256                      # im2col fusion for shallow C_in

    # ---- glue: layout + zero padding (conv pad + tile alignment) -----------
    right_pad = l_x - padding - l
    x_pad = jnp.pad(x_nlc, ((0, 0), (padding, right_pad), (0, 0)))   # (B, L_x, C_in)

    w_kio = jnp.transpose(weight, (2, 1, 0))                         # (K, C_in, C_out)
    w_kio = jnp.pad(w_kio, ((0, 0), (0, 0), (0, c_out_pad - c_out)))
    if use_bf16_matmul:
        w_kio = w_kio.astype(jnp.bfloat16)
    w_arr = w_kio.reshape(k * c_in, c_out_pad) if fuse else w_kio
    b_arr = jnp.pad(bias, (0, c_out_pad - c_out)).astype(jnp.float32).reshape(1, c_out_pad)

    # ---- BlockSpecs ----------------------------------------------------------
    x_spec = pl.BlockSpec((1, tl, c_in), lambda bb, lt: (bb, lt, 0))
    xh_spec = pl.BlockSpec((1, halo, c_in),
                           lambda bb, lt: (bb, (lt + 1) * halo_stride, 0))
    if fuse:
        w_spec = pl.BlockSpec((k * c_in, c_out_pad), lambda bb, lt: (0, 0))
    else:
        w_spec = pl.BlockSpec((k, c_in, c_out_pad), lambda bb, lt: (0, 0, 0))
    b_spec = pl.BlockSpec((1, c_out_pad), lambda bb, lt: (0, 0))
    o_spec = pl.BlockSpec((1, tl, c_out_pad), lambda bb, lt: (bb, lt, 0))

    # ---- VMEM budget: double-buffered tiles + resident weights + scratch ----
    w_itemsize = jnp.dtype(w_arr.dtype).itemsize
    est = (2 * (tl * c_in + halo * c_in + tl * c_out_pad) * itemsize
           + k * c_in * c_out_pad * w_itemsize + c_out_pad * 4
           + ((tl + halo) * c_in + tl * k * c_in + 2 * tl * co_chunk) * 4)
    vmem_limit = int(min(32 * 1024 * 1024, max(4 * est, 8 * 1024 * 1024)))

    kernel = functools.partial(_conv1d_relu_kernel,
                               k_taps=k, fuse=fuse, co_chunk=co_chunk)

    out = pl.pallas_call(
        kernel,
        out_shape=jax.ShapeDtypeStruct((b, l_out_alloc, c_out_pad), x_nlc.dtype),
        grid_spec=pltpu.PrefetchScalarGridSpec(
            num_scalar_prefetch=0,
            grid=(b, num_l_tiles),
            in_specs=[x_spec, xh_spec, w_spec, b_spec],
            out_specs=o_spec,
        ),
        compiler_params=pltpu.CompilerParams(
            dimension_semantics=("parallel", "parallel"),
            vmem_limit_bytes=vmem_limit),
    )(x_pad, x_pad, w_arr, b_arr)

    # Strip C_out / L padding (no-op when shapes are already aligned).
    return out[:, :l_out, :c_out]


@functools.partial(jax.jit, static_argnames=("stride", "padding", "use_bf16_matmul"))
def conv1d_relu(x_ncl, weight, bias, *, stride=1, padding=0, use_bf16_matmul=False):
    """PyTorch-convention Conv1d+ReLU: x_ncl (B, C_in, L) -> (B, C_out, L_out)."""
    out_nlc = conv1d_relu_nlc(jnp.transpose(x_ncl, (0, 2, 1)), weight, bias,
                              stride=stride, padding=padding,
                              use_bf16_matmul=use_bf16_matmul)
    return jnp.transpose(out_nlc, (0, 2, 1))


if __name__ == "__main__":
    key = jax.random.PRNGKey(0)
    k_x, k_w, k_b = jax.random.split(key, 3)

    # Module hyperparams (deterministic, in-script "init").
    in_channels, out_channels, kernel_size, stride, padding = 4, 8, 3, 1, 1
    batch, length = 2, 16

    x = jax.random.normal(k_x, (batch, in_channels, length), jnp.float32)
    # PyTorch Conv1d weight layout: (out_channels, in_channels, kernel_size)
    fan_in = in_channels * kernel_size
    bound = 1.0 / (fan_in ** 0.5)
    weight = jax.random.uniform(k_w, (out_channels, in_channels, kernel_size),
                                jnp.float32, -bound, bound)
    bias = jax.random.uniform(k_b, (out_channels,), jnp.float32, -bound, bound)

    out = conv1d_relu(x, weight, bias, stride=stride, padding=padding)
    jax.block_until_ready(out)

    # Sanity-check against a plain-JAX reference of Conv1d+ReLU.
    ref = jax.lax.conv_general_dilated(
        x, weight, window_strides=(stride,), padding=[(padding, padding)],
        dimension_numbers=("NCH", "OIH", "NCH"))
    ref = jnp.maximum(ref + bias[None, :, None], 0.0)
    assert out.shape == ref.shape == (batch, out_channels, length)
    assert jnp.allclose(out, ref, atol=1e-5, rtol=1e-5)

    print("KERNEL_OK")
</pallas_src>

<mosaic_0001>
module attributes {stable_mosaic.version = 11 : i64} {
  func.func @_conv1d_relu_kernel(%arg0: i32, %arg1: i32, %arg2: memref<1x16x4xf32, #tpu.memory_space<vmem>>, %arg3: memref<1x8x4xf32, #tpu.memory_space<vmem>>, %arg4: memref<12x128xf32, #tpu.memory_space<vmem>>, %arg5: memref<1x128xf32, #tpu.memory_space<vmem>>, %arg6: memref<1x16x128xf32, #tpu.memory_space<vmem>>) attributes {dimension_semantics = [#tpu.dimension_semantics<parallel>, #tpu.dimension_semantics<parallel>], iteration_bounds = array<i64: 2, 1>, scalar_prefetch = 0 : i64, scratch_operands = 0 : i64, tpu.core_type = #tpu.core_type<tc>, window_params = [{transform_indices = @transform_0, window_bounds = array<i64: 1, 16, 4>}, {transform_indices = @transform_1, window_bounds = array<i64: 1, 8, 4>}, {pipeline_mode = #tpu.pipeline_mode<synchronous>, transform_indices = @transform_2, window_bounds = array<i64: 12, 128>}, {pipeline_mode = #tpu.pipeline_mode<synchronous>, transform_indices = @transform_3, window_bounds = array<i64: 1, 128>}, {transform_indices = @transform_4, window_bounds = array<i64: 1, 16, 128>}]} {
    %c0 = arith.constant 0 : index
    %c0_0 = arith.constant 0 : index
    %c0_1 = arith.constant 0 : index
    %0 = vector.load %arg2[%c0, %c0_0, %c0_1] : memref<1x16x4xf32, #tpu.memory_space<vmem>>, vector<1x16x4xf32>
    %1 = vector.shape_cast %0 : vector<1x16x4xf32> to vector<16x4xf32>
    %c0_2 = arith.constant 0 : index
    %c0_3 = arith.constant 0 : index
    %c0_4 = arith.constant 0 : index
    %2 = vector.load %arg3[%c0_2, %c0_3, %c0_4] : memref<1x8x4xf32, #tpu.memory_space<vmem>>, vector<1x8x4xf32>
    %3 = vector.shape_cast %2 : vector<1x8x4xf32> to vector<8x4xf32>
    %4 = tpu.concatenate %1, %3 in 0 : vector<16x4xf32>, vector<8x4xf32> -> vector<24x4xf32>
    %5 = vector.extract_strided_slice %4 {offsets = [0, 0], sizes = [16, 4], strides = [1, 1]} : vector<24x4xf32> to vector<16x4xf32>
    %6 = vector.extract_strided_slice %4 {offsets = [1, 0], sizes = [16, 4], strides = [1, 1]} : vector<24x4xf32> to vector<16x4xf32>
    %7 = vector.extract_strided_slice %4 {offsets = [2, 0], sizes = [16, 4], strides = [1, 1]} : vector<24x4xf32> to vector<16x4xf32>
    %8 = tpu.concatenate %5, %6, %7 in 1 : vector<16x4xf32>, vector<16x4xf32>, vector<16x4xf32> -> vector<16x12xf32>
    %c0_5 = arith.constant 0 : index
    %c0_6 = arith.constant 0 : index
    %9 = vector.load %arg5[%c0_5, %c0_6] : memref<1x128xf32, #tpu.memory_space<vmem>>, vector<1x128xf32>
    %10 = vector.shape_cast %9 : vector<1x128xf32> to vector<1x128xf32>
    %11 = vector.broadcast %10 : vector<1x128xf32> to vector<16x128xf32>
    %c0_7 = arith.constant 0 : index
    %c0_8 = arith.constant 0 : index
    %12 = vector.load %arg4[%c0_7, %c0_8] : memref<12x128xf32, #tpu.memory_space<vmem>>, vector<12x128xf32>
    %cst = arith.constant dense<0.000000e+00> : vector<16x128xf32>
    %13 = tpu.matmul %8, %12, %cst {dimension_numbers = #tpu.dot_dimension_numbers<[1], [0], [0], [1], [0, 0, 1, 1], [], []>} : vector<16x12xf32>, vector<12x128xf32>, vector<16x128xf32> -> vector<16x128xf32>
    %14 = arith.addf %11, %13 : vector<16x128xf32>
    %cst_9 = arith.constant 0.000000e+00 : f32
    %15 = vector.broadcast %cst_9 : f32 to vector<16x128xf32>
    %16 = arith.maximumf %14, %15 : vector<16x128xf32>
    %c0_10 = arith.constant 0 : index
    %c0_11 = arith.constant 0 : index
    %c0_12 = arith.constant 0 : index
    %17 = vector.load %arg6[%c0_10, %c0_11, %c0_12] : memref<1x16x128xf32, #tpu.memory_space<vmem>>, vector<1x16x128xf32>
    %18 = vector.shape_cast %17 : vector<1x16x128xf32> to vector<16x128xf32>
    %19 = vector.shape_cast %16 : vector<16x128xf32> to vector<1x16x128xf32>
    tpu.vector_store %arg6[%c0_10, %c0_11, %c0_12], %19 {strides = array<i32>} : memref<1x16x128xf32, #tpu.memory_space<vmem>>, vector<1x16x128xf32>,
    return
  }
  func.func @transform_0(%arg0: i32, %arg1: i32) -> (i32, i32, i32) {
    %c0_i32 = arith.constant 0 : i32
    %c0_i32_0 = arith.constant 0 : i32
    return %arg0, %arg1, %c0_i32 : i32, i32, i32
  }
  func.func @transform_1(%arg0: i32, %arg1: i32) -> (i32, i32, i32) {
    %c1_i32 = arith.constant 1 : i32
    %0 = arith.addi %arg1, %c1_i32 : i32
    %c2_i32 = arith.constant 2 : i32
    %1 = arith.muli %0, %c2_i32 : i32
    %c0_i32 = arith.constant 0 : i32
    %c0_i32_0 = arith.constant 0 : i32
    return %arg0, %1, %c0_i32 : i32, i32, i32
  }
  func.func @transform_2(%arg0: i32, %arg1: i32) -> (i32, i32) {
    %c0_i32 = arith.constant 0 : i32
    %c0_i32_0 = arith.constant 0 : i32
    %c0_i32_1 = arith.constant 0 : i32
    return %c0_i32, %c0_i32_0 : i32, i32
  }
  func.func @transform_3(%arg0: i32, %arg1: i32) -> (i32, i32) {
    %c0_i32 = arith.constant 0 : i32
    %c0_i32_0 = arith.constant 0 : i32
    %c0_i32_1 = arith.constant 0 : i32
    return %c0_i32, %c0_i32_0 : i32, i32
  }
  func.func @transform_4(%arg0: i32, %arg1: i32) -> (i32, i32, i32) {
    %c0_i32 = arith.constant 0 : i32
    %c0_i32_0 = arith.constant 0 : i32
    return %arg0, %arg1, %c0_i32 : i32, i32, i32
  }
}

</mosaic_0001>

<bundles_post_ra>
// kernel: conv1d_relu.1
= control target key start
LH: loop header
LB: loop body
LE: loop exit
PB: predicated region body
PF: predicated region fallthrough
CT: control target
= control target key end

     0   :  { %s661_s15 = smov 0   ;;  %s663_s16 = smov 0   ;;  %s714_s0 = inlined_call_operand.vmem [shape: f32[2,24,4], index: 0, kind: input, shape index: {}, may-alias: {0,1}]   ;;  %s715_s1 = inlined_call_operand.vmem [shape: f32[2,24,4], index: 1, kind: input, shape index: {}, may-alias: {0,1}]   ;;  %s716_s2 = inlined_call_operand.vmem [shape: f32[12,128], index: 2, kind: input, shape index: {}]   ;;  %s717_s3 = inlined_call_operand.vmem [shape: f32[1,128], index: 3, kind: input, shape index: {}]   ;;  %s718_s4 = inlined_call_operand.vmem [shape: f32[2,16,128], index: 4, kind: output, shape index: {}]  }
   0x1   :  { %s665_s17 = smov 0  }
   0x2 LB: > { %s26_s18 = sadd.s32 1, %s627_s16  ;;  %p548_p0 = scmp.ge.s32.totalorder %s631_s17, 1  ;;  %s631_s17 = sphi %s665_s17, %s14_s17   ;;  %s627_s16 = sphi %s663_s16, %s720_s16   ;;  %s623_s15 = sphi %s661_s15, %s719_s15  }
   0x3   : > { %p28_p1 = scmp.ge.s32.totalorder %s26_s18, 2  ;;  %p214_p2 = scmp.lt.s32.totalorder %s631_s17, 3 }
   0x5   : > { %s722_s18 = smov (%p28_p1, %s26_s18), 0  ;;  %p215_p3 = pnand %p548_p0, %p214_p2 }
   0x6   : > { %p267_p4 = scmp.lt.s32.totalorder (!%p215_p3), %s623_s15, 1  ;;  %v345_v0 = vld [vmem:[%s716_s2] sm:$0xff] (!%p215_p3)  ;;  %v346_v1 = vld [vmem:[%s716_s2 + $0x8] sm:$0xf] (!%p215_p3)  ;;  %vm354_vm0 = vcmask (!%p215_p3), 1043456   ;;  %vm633_vm1 = vmmov (!%p215_p3), 1  }
   0x7   : > { %218 = sbr.rel (%p215_p3) target bundleno = 361 (0x169), region = 36  ;;  %v573_v2 = vpack.c.bf16 (!%p215_p3), %v346_v1, %v345_v0  ;;  %vm574_vm2 = vmpackc.low (!%p215_p3), %vm354_vm0, %vm633_vm1  ;;  %vm308_vm3 = vcmask (!%p215_p3), 1046528   ;;  %vm320_vm4 = vcmask (!%p215_p3), 1045504   ;;  %s634_s5 = smov (!%p215_p3), 4   ;;  %vm332_vm5 = vcmask (!%p215_p3), 31744  }
   0x8   : > { %s635_s6 = smov (!%p215_p3), 8   ;;  %vm335_vm6 = vcmask (!%p215_p3), 64512   ;;  %vm347_vm7 = vcmask (!%p215_p3), 97280   ;;  %v553_v24 = vld [vmem:[%s717_s3] ss:$0 sm:$0xff] (!%p215_p3) }
   0x9   : > { %575 = vmatprep.subr.msk.bf16.mxu0 (!%p215_p3), %vm574_vm2, %v573_v2 }
   0xa   : > { %578 = vmatpush3.bf16.msk.msra.mxu0 (!%p215_p3), %vm574_vm2, %v573_v2 }
   0xe   : > { %s724_s15 = smov (!%p267_p4, %s623_s15), 1 }
   0xf   : > { %s579_s23 = smul.u32 24, %s724_s15  ;;  %s561_s9 = sshll.u32 %s724_s15, 4 }
  0x10   : > { %s300_s12 = scalar_lea.vmem %s718_s4, %s561_s9 }
  0x11   : > { %s274_s26 = scalar_lea.vmem %s714_s0, %s579_s23  ;;  %s560_s27 = sadd.s32 16, %s579_s23 }
  0x12   : > { %v302_v3 = vld [vmem:[%s274_s26] sm:$0xff]  ;;  %v303_v4 = vld [vmem:[%s274_s26 + $0x8] sm:$0xff]  ;;  %s289_s30 = scalar_lea.vmem %s715_s1, %s560_s27 }
  0x13   : > { %v309_v5 = vrot.slane %v302_v3, 1  ;;  %v310_v6 = vrot.slane %v303_v4, 1  ;;  %v321_v7 = vrot.slane %v302_v3, 2  ;;  %v322_v8 = vrot.slane %v303_v4, 2  ;;  %v304_v9 = vld [vmem:[%s289_s30] sm:$0xff] }
  0x14   : > { %v312_v10 = vrot.slane %v304_v9, 1  ;;  %v324_v11 = vrot.slane %v304_v9, 2 }
  0x15   : > { %v311_v12 = vsel %vm308_vm3, %v309_v5, %v310_v6  ;;  %v323_v13 = vsel %vm320_vm4, %v321_v7, %v322_v8 }
  0x16   : > { %314 = vrot.lane.b32.xlu0 %v311_v12, %s634_s5  ;;  %326 = vrot.lane.b32.xlu1 %v323_v13, %s635_s6  ;;  %v313_v14 = vsel %vm308_vm3, %v310_v6, %v312_v10  ;;  %v325_v15 = vsel %vm320_vm4, %v322_v8, %v324_v11 }
  0x1a   : > { %316 = vrot.lane.b32.xlu0 %v313_v14, %s634_s5  ;;  %328 = vrot.lane.b32.xlu1 %v325_v15, %s635_s6 }
  0x88   : > { %v315_v16 = vpop.permute.xlu0 %314  ;;  %v327_v17 = vpop.permute.xlu1 %326 }
  0x89   : > { %v333_v18 = vsel %vm332_vm5, %v302_v3, %v315_v16 }
  0x8a   : > { %v336_v19 = vsel %vm335_vm6, %v333_v18, %v327_v17 }
  0x8b   : > { %570 = vmatprep.mubr.msk.f32.mxu0 %vm347_vm7, %v336_v19 }
  0x8c   : > { %v317_v20 = vpop.permute.xlu0 %316  ;;  %v329_v21 = vpop.permute.xlu1 %328 }
  0x8d   : > { %v334_v22 = vsel %vm332_vm5, %v303_v4, %v317_v20 }
  0x8e   : > { %v337_v23 = vsel %vm335_vm6, %v334_v22, %v329_v21 }
  0x8f   : > { %571 = vmatmul.mubr.msk.f32.vlgmr.msra.gmra.mrb[0].mxu0 %vm347_vm7, %v337_v23 }
 0x162   : > { %v572_v25 = vpop.f32.mrb[0].mxu0 }
 0x163   : > { %v434_v26 = vadd.f32 %v572_v25, %v553_v24  ;;  %v424_v27 = vpop.f32.mrb[1].mxu0 }
 0x164   : > { %v433_v28 = vadd.f32 %v553_v24, %v424_v27 }
 0x165   : > { %v436_v29 = vmax.f32 %v434_v26, 0.0 }
 0x166   : > { %v435_v30 = vmax.f32 %v433_v28, 0.0 }
 0x167   : > { %438 = vst [vmem:[%s300_s12 + $0x8] sm:$0xff] %v436_v29 }
 0x168   : > { %437 = vst [vmem:[%s300_s12] sm:$0xff] %v435_v30 }
 0x169 PF: > { %s14_s17 = sadd.s32 1, %s631_s17   ;;  %s719_s15 = smov %s627_s16 }
 0x16a   : > { %p11_p5 = scmp.ge.s32.totalorder %s14_s17, 4   ;;  %s720_s16 = smov %s722_s18 }
 0x16c   :  { %13 = sbr.rel (!%p11_p5) target bundleno = 2 (0x2), region = 69 }

</bundles_post_ra>
